<compile_context>
chip_gen: v6e
topology: v6e:2x2x1
jax: 0.10.0
libtpu: 0.0.40
codegen_flags: <defaults>
</compile_context>

<pallas_src>
import functools

import jax
import jax.numpy as jnp
from jax import lax
from jax.experimental import pallas as pl
from jax.experimental.pallas import tpu as pltpu


_EPS = 1e-12  # torch.nn.functional.normalize(p=2, dim=1) default eps
_ROW_TILE_CANDIDATES = (2048, 1024, 512, 256, 128, 64, 32, 16, 8)


def _round_up(x, mult):
    return ((x + mult - 1) // mult) * mult


def _default_col_tile(m):
    # tn must be a multiple of 128 (MXU / lane width); prefer 256 when it does
    # not increase padding (256-wide MXU on v6e/v7x), else 128.
    tn, pad = 128, _round_up(m, 128)
    if _round_up(m, 256) <= pad:
        tn = 256
    return tn


def _default_row_tile(n, d, itemsize, tn):
    # Double-buffered a tile + double-buffered b tile + f32 (tm, tn) score
    # working set must fit comfortably under the scoped-VMEM limit we request.
    vmem_budget = 24 << 20
    # Keep at least two row tiles when N allows (v7x megacore), and avoid
    # padding a tiny N up to a huge tile.
    cap = _round_up(max(n // 2, 8), 8)
    for t in _ROW_TILE_CANDIDATES:
        if t > cap:
            continue
        need = 2 * t * d * itemsize + 2 * tn * d * itemsize + 4 * t * tn * 4
        if need <= vmem_budget:
            return t
    return 8


def _mi_loss_kernel(a_ref, b_ref, inv_b_ref, labels_ref, loss_ref, stats_ref, *,
                    scale, col_tile, m_valid, mask_cols):
    # stats_ref columns: 0 = scale/||a_i||, 1 = running max, 2 = running
    # sum-exp, 3 = picked (label) logit.  One lane-padded allocation.
    j = pl.program_id(1)
    nj = pl.num_programs(1)
    rows = a_ref.shape[0]
    eps2 = jnp.float32(_EPS * _EPS)

    # ---- init once per row tile (the a tile is resident across the j sweep)
    @pl.when(j == 0)
    def _():
        a32 = a_ref[...].astype(jnp.float32)                           # (tm, D)
        ssq = jnp.sum(a32 * a32, axis=1, keepdims=True)                # (tm, 1)
        # scale folded into the reciprocal row norm of a (rsqrt -> EUP slot).
        stats_ref[:, 0:1] = jnp.float32(scale) * lax.rsqrt(jnp.maximum(ssq, eps2))
        stats_ref[:, 1:2] = jnp.full((rows, 1), -jnp.inf, jnp.float32)
        zero = jnp.zeros((rows, 1), jnp.float32)
        stats_ref[:, 2:3] = zero
        stats_ref[:, 3:4] = zero

    # ---- MXU: contract last dims of both operands (no b transpose), f32 acc.
    raw = lax.dot_general(a_ref[...], b_ref[...],
                          dimension_numbers=(((1,), (1,)), ((), ())),
                          preferred_element_type=jnp.float32)          # (tm, tn)
    # post-scale: rows by scale/||a_i|| (tm,1), columns by 1/||b_j|| (1,tn).
    scores = raw * stats_ref[:, 0:1] * inv_b_ref[...]                  # (tm, tn)

    # ---- picked (label) logit: plain iota vs (labels - j*tn), mul-accumulate
    tn = scores.shape[1]
    col = lax.broadcasted_iota(jnp.int32, (rows, tn), 1)               # 0..tn-1
    hit = (col == (labels_ref[...] - j * col_tile)).astype(jnp.float32)
    stats_ref[:, 3:4] = stats_ref[:, 3:4] + jnp.sum(scores * hit, axis=1,
                                                    keepdims=True)

    # ---- mask padded columns (only emitted when M was padded; static flag)
    if mask_cols:
        scores = jnp.where(col < (m_valid - j * col_tile), scores, -jnp.inf)

    # ---- online logsumexp (flash-attention style), all (tm, 1) keepdims
    m_prev = stats_ref[:, 1:2]
    m_new = jnp.maximum(m_prev, jnp.max(scores, axis=1, keepdims=True))
    alpha = jnp.exp(m_prev - m_new)
    # TODO(synk): on v6e/v7x (bf16 EUP) the (tm,tn) exp could run in bf16 when
    #             D is small enough to be EUP-bound; keep f32 on v5e.
    p_sum = jnp.sum(jnp.exp(scores - m_new), axis=1, keepdims=True)
    stats_ref[:, 2:3] = alpha * stats_ref[:, 2:3] + p_sum
    stats_ref[:, 1:2] = m_new

    # ---- finalize: per-row cross entropy = logsumexp - picked
    @pl.when(j == nj - 1)
    def _():
        loss_ref[...] = (stats_ref[:, 1:2] + jnp.log(stats_ref[:, 2:3])
                         - stats_ref[:, 3:4])


def mutual_information_loss(embeddings_a, embeddings_b, labels, *,
                            scale=20.0, weights=None, tm=None, tn=None,
                            cast_to_bf16=False):
    """embeddings_a: (N, D), embeddings_b: (M, D), labels: (N,) int -> scalar f32."""
    n, d = embeddings_a.shape
    m, d_b = embeddings_b.shape
    assert d == d_b, "feature dims must match"
    assert embeddings_a.dtype == embeddings_b.dtype, "a/b dtypes must match"

    # --- hoisted b normalization: one O(M*D) f32 pass, applied post-matmul
    b32 = embeddings_b.astype(jnp.float32)
    inv_b = lax.rsqrt(jnp.maximum(jnp.sum(b32 * b32, axis=1),
                                  jnp.float32(_EPS * _EPS)))            # (M,)

    a_in, b_in = embeddings_a, embeddings_b
    if cast_to_bf16 and a_in.dtype == jnp.float32:
        # Halves the dominant (re-read) b HBM stream and uses the fast bf16
        # MXU path; normalization / accumulation / LSE all stay f32.
        a_in = a_in.astype(jnp.bfloat16)
        b_in = b_in.astype(jnp.bfloat16)
    itemsize = jnp.dtype(a_in.dtype).itemsize

    # --- tile selection (tn always a multiple of 128; tm as big as VMEM allows)
    tn = _default_col_tile(m) if tn is None else tn
    assert tn % 128 == 0, "tn must be a multiple of 128"
    tm = _default_row_tile(n, d, itemsize, tn) if tm is None else tm
    assert tm % 8 == 0, "tm must be a multiple of 8"

    # --- pad N / M to tile multiples; padded columns get masked to -inf in the
    #     kernel, padded rows are dropped before the mean.
    n_pad = _round_up(n, tm)
    m_pad = _round_up(m, tn)
    if n_pad != n:
        a_in = jnp.pad(a_in, ((0, n_pad - n), (0, 0)))
    if m_pad != m:
        b_in = jnp.pad(b_in, ((0, m_pad - m), (0, 0)))
    inv_b2d = jnp.pad(inv_b, (0, m_pad - m)).reshape(1, m_pad)
    labels2d = jnp.pad(labels.astype(jnp.int32), (0, n_pad - n)).reshape(n_pad, 1)

    grid = (n_pad // tm, m_pad // tn)

    kernel = functools.partial(_mi_loss_kernel, scale=float(scale),
                               col_tile=tn, m_valid=m,
                               mask_cols=(m_pad != m))

    losses = pl.pallas_call(
        kernel,
        out_shape=jax.ShapeDtypeStruct((n_pad, 1), jnp.float32),
        grid_spec=pltpu.PrefetchScalarGridSpec(
            num_scalar_prefetch=0,
            grid=grid,
            in_specs=[
                pl.BlockSpec((tm, d), lambda i, j: (i, 0)),   # a row tile (resident over j)
                pl.BlockSpec((tn, d), lambda i, j: (j, 0)),   # b column tile
                pl.BlockSpec((1, tn), lambda i, j: (0, j)),   # precomputed 1/||b_j||
                pl.BlockSpec((tm, 1), lambda i, j: (i, 0)),   # labels
            ],
            out_specs=pl.BlockSpec((tm, 1), lambda i, j: (i, 0)),
            scratch_shapes=[
                # packed per-row accumulators: [scale/||a||, max, sumexp, picked]
                pltpu.VMEM((tm, 4), jnp.float32),
            ],
        ),
        compiler_params=pltpu.CompilerParams(
            dimension_semantics=("parallel", "arbitrary"),
            # Raise v5e's 16 MiB scoped default; safe on v6e/v7x.  The tile
            # picker targets <= 24 MiB of live buffers.
            vmem_limit_bytes=32 * 1024 * 1024,
        ),
    )(a_in, b_in, inv_b2d, labels2d)

    losses = losses[:n, 0]
    if weights is not None:
        losses = losses * weights  # PyTorch module does mean(losses * weights)
    return jnp.mean(losses)


if __name__ == "__main__":
    key = jax.random.PRNGKey(0)
    ka, kb, kw = jax.random.split(key, 3)

    # Small shapes that still exercise the interesting paths:
    #   N=50  -> padded to a multiple of tm (padded rows dropped from the mean)
    #   M=300 -> tn=128, padded to 384: 3 column tiles (online-LSE accumulation
    #            across j) plus -inf masking of the 84 padded columns.
    N, M, D = 50, 300, 32
    a = jax.random.normal(ka, (N, D), dtype=jnp.float32)
    b = jax.random.normal(kb, (M, D), dtype=jnp.float32)
    labels = (jnp.arange(N, dtype=jnp.int32) * 7 + 3) % M

    loss = mutual_information_loss(a, b, labels)
    jax.block_until_ready(loss)

    # plain-JAX f32 reference (matches the PyTorch module)
    a_n = a / jnp.maximum(jnp.linalg.norm(a, axis=1, keepdims=True), 1e-12)
    b_n = b / jnp.maximum(jnp.linalg.norm(b, axis=1, keepdims=True), 1e-12)
    scores = a_n @ b_n.T * 20.0
    per_row = jax.nn.logsumexp(scores, axis=1) - scores[jnp.arange(N), labels]
    ref = jnp.mean(per_row)
    assert jnp.allclose(loss, ref, atol=5e-4, rtol=5e-4), (loss, ref)

    # weights path (PyTorch: mean(losses * weights))
    w = jax.random.uniform(kw, (N,), dtype=jnp.float32)
    loss_w = mutual_information_loss(a, b, labels, weights=w)
    ref_w = jnp.mean(per_row * w)
    assert jnp.allclose(loss_w, ref_w, atol=5e-4, rtol=5e-4), (loss_w, ref_w)

    # bf16-MXU fast path (looser tolerance; accumulation stays f32)
    loss_bf16 = mutual_information_loss(a, b, labels, cast_to_bf16=True)
    assert jnp.allclose(loss_bf16, ref, atol=3e-2, rtol=3e-2), (loss_bf16, ref)

    print("KERNEL_OK")
</pallas_src>

<mosaic_0001>
module attributes {stable_mosaic.version = 11 : i64} {
  func.func @_mi_loss_kernel(%arg0: i32, %arg1: i32, %arg2: memref<32x32xf32, #tpu.memory_space<vmem>>, %arg3: memref<128x32xf32, #tpu.memory_space<vmem>>, %arg4: memref<1x128xf32, #tpu.memory_space<vmem>>, %arg5: memref<32x1xi32, #tpu.memory_space<vmem>>, %arg6: memref<32x1xf32, #tpu.memory_space<vmem>>, %arg7: memref<32x4xf32, #tpu.memory_space<vmem>>) attributes {dimension_semantics = [#tpu.dimension_semantics<parallel>, #tpu.dimension_semantics<arbitrary>], iteration_bounds = array<i64: 2, 3>, scalar_prefetch = 0 : i64, scratch_operands = 1 : i64, tpu.core_type = #tpu.core_type<tc>, window_params = [{transform_indices = @transform_0, window_bounds = array<i64: 32, 32>}, {transform_indices = @transform_1, window_bounds = array<i64: 128, 32>}, {transform_indices = @transform_2, window_bounds = array<i64: 1, 128>}, {transform_indices = @transform_3, window_bounds = array<i64: 32, 1>}, {transform_indices = @transform_4, window_bounds = array<i64: 32, 1>}]} {
    %c0_i32 = arith.constant 0 : i32
    %0 = arith.cmpi eq, %arg1, %c0_i32 : i32
    %1 = arith.extui %0 : i1 to i32
    %cst = arith.constant 1.000000e-24 : f32
    %c0_i32_0 = arith.constant 0 : i32
    %2 = arith.cmpi ne, %1, %c0_i32_0 : i32
    scf.if %2 {
      %c0_26 = arith.constant 0 : index
      %c0_27 = arith.constant 0 : index
      %52 = vector.load %arg2[%c0_26, %c0_27] : memref<32x32xf32, #tpu.memory_space<vmem>>, vector<32x32xf32>
      %53 = arith.mulf %52, %52 : vector<32x32xf32>
      %cst_28 = arith.constant dense<0.000000e+00> : vector<32xf32>
      %54 = vector.multi_reduction <add>, %53, %cst_28 [1] : vector<32x32xf32> to vector<32xf32>
      %55 = vector.shape_cast %54 : vector<32xf32> to vector<32x1xf32>
      %56 = vector.broadcast %cst : f32 to vector<32x1xf32>
      %57 = arith.maximumf %55, %56 : vector<32x1xf32>
      %58 = math.rsqrt %57 : vector<32x1xf32>
      %cst_29 = arith.constant 2.000000e+01 : f32
      %59 = vector.broadcast %cst_29 : f32 to vector<32x1xf32>
      %60 = arith.mulf %59, %58 : vector<32x1xf32>
      %c0_30 = arith.constant 0 : index
      %c0_31 = arith.constant 0 : index
      %61 = vector.load %arg7[%c0_30, %c0_31] : memref<32x4xf32, #tpu.memory_space<vmem>>, vector<32x1xf32>
      tpu.vector_store %arg7[%c0_30, %c0_31], %60 {strides = array<i32>} : memref<32x4xf32, #tpu.memory_space<vmem>>, vector<32x1xf32>,
      %cst_32 = arith.constant 0xFF800000 : f32
      %62 = vector.broadcast %cst_32 : f32 to vector<32x1xf32>
      %c0_33 = arith.constant 0 : index
      %c1_34 = arith.constant 1 : index
      %63 = vector.load %arg7[%c0_33, %c1_34] : memref<32x4xf32, #tpu.memory_space<vmem>>, vector<32x1xf32>
      tpu.vector_store %arg7[%c0_33, %c1_34], %62 {strides = array<i32>} : memref<32x4xf32, #tpu.memory_space<vmem>>, vector<32x1xf32>,
      %cst_35 = arith.constant 0.000000e+00 : f32
      %64 = vector.broadcast %cst_35 : f32 to vector<32x1xf32>
      %c0_36 = arith.constant 0 : index
      %c2_37 = arith.constant 2 : index
      %65 = vector.load %arg7[%c0_36, %c2_37] : memref<32x4xf32, #tpu.memory_space<vmem>>, vector<32x1xf32>
      tpu.vector_store %arg7[%c0_36, %c2_37], %64 {strides = array<i32>} : memref<32x4xf32, #tpu.memory_space<vmem>>, vector<32x1xf32>,
      %c0_38 = arith.constant 0 : index
      %c3_39 = arith.constant 3 : index
      %66 = vector.load %arg7[%c0_38, %c3_39] : memref<32x4xf32, #tpu.memory_space<vmem>>, vector<32x1xf32>
      tpu.vector_store %arg7[%c0_38, %c3_39], %64 {strides = array<i32>} : memref<32x4xf32, #tpu.memory_space<vmem>>, vector<32x1xf32>,
    } else {
    }
    %c0 = arith.constant 0 : index
    %c0_1 = arith.constant 0 : index
    %3 = vector.load %arg2[%c0, %c0_1] : memref<32x32xf32, #tpu.memory_space<vmem>>, vector<32x32xf32>
    %c0_2 = arith.constant 0 : index
    %c0_3 = arith.constant 0 : index
    %4 = vector.load %arg3[%c0_2, %c0_3] : memref<128x32xf32, #tpu.memory_space<vmem>>, vector<128x32xf32>
    %cst_4 = arith.constant dense<0.000000e+00> : vector<32x128xf32>
    %5 = tpu.matmul %3, %4, %cst_4 {dimension_numbers = #tpu.dot_dimension_numbers<[1], [1], [0], [0], [0, 0, 1, 0], [], []>} : vector<32x32xf32>, vector<128x32xf32>, vector<32x128xf32> -> vector<32x128xf32>
    %c0_5 = arith.constant 0 : index
    %c0_6 = arith.constant 0 : index
    %6 = vector.load %arg7[%c0_5, %c0_6] : memref<32x4xf32, #tpu.memory_space<vmem>>, vector<32x1xf32>
    %7 = vector.broadcast %6 : vector<32x1xf32> to vector<32x128xf32>
    %8 = arith.mulf %5, %7 : vector<32x128xf32>
    %c0_7 = arith.constant 0 : index
    %c0_8 = arith.constant 0 : index
    %9 = vector.load %arg4[%c0_7, %c0_8] : memref<1x128xf32, #tpu.memory_space<vmem>>, vector<1x128xf32>
    %10 = vector.broadcast %9 : vector<1x128xf32> to vector<32x128xf32>
    %11 = arith.mulf %8, %10 : vector<32x128xf32>
    %12 = tpu.iota {dimensions = array<i32: 1>} : vector<32x128xi32>
    %c0_9 = arith.constant 0 : index
    %c0_10 = arith.constant 0 : index
    %13 = vector.load %arg5[%c0_9, %c0_10] : memref<32x1xi32, #tpu.memory_space<vmem>>, vector<32x1xi32>
    %c128_i32 = arith.constant 128 : i32
    %14 = arith.muli %arg1, %c128_i32 : i32
    %15 = vector.broadcast %14 : i32 to vector<32x1xi32>
    %16 = arith.subi %13, %15 : vector<32x1xi32>
    %17 = vector.broadcast %16 : vector<32x1xi32> to vector<32x128xi32>
    %18 = arith.cmpi eq, %12, %17 : vector<32x128xi32>
    %19 = arith.extui %18 : vector<32x128xi1> to vector<32x128xi32>
    %20 = arith.sitofp %19 : vector<32x128xi32> to vector<32x128xf32>
    %c0_11 = arith.constant 0 : index
    %c3 = arith.constant 3 : index
    %21 = vector.load %arg7[%c0_11, %c3] : memref<32x4xf32, #tpu.memory_space<vmem>>, vector<32x1xf32>
    %22 = arith.mulf %11, %20 : vector<32x128xf32>
    %cst_12 = arith.constant dense<0.000000e+00> : vector<32xf32>
    %23 = vector.multi_reduction <add>, %22, %cst_12 [1] : vector<32x128xf32> to vector<32xf32>
    %24 = vector.shape_cast %23 : vector<32xf32> to vector<32x1xf32>
    %25 = arith.addf %21, %24 : vector<32x1xf32>
    %c0_13 = arith.constant 0 : index
    %c3_14 = arith.constant 3 : index
    %26 = vector.load %arg7[%c0_13, %c3_14] : memref<32x4xf32, #tpu.memory_space<vmem>>, vector<32x1xf32>
    tpu.vector_store %arg7[%c0_13, %c3_14], %25 {strides = array<i32>} : memref<32x4xf32, #tpu.memory_space<vmem>>, vector<32x1xf32>,
    %c128_i32_15 = arith.constant 128 : i32
    %27 = arith.muli %arg1, %c128_i32_15 : i32
    %c300_i32 = arith.constant 300 : i32
    %28 = arith.subi %c300_i32, %27 : i32
    %29 = vector.broadcast %28 : i32 to vector<32x128xi32>
    %30 = arith.cmpi slt, %12, %29 : vector<32x128xi32>
    %cst_16 = arith.constant 0xFF800000 : f32
    %31 = vector.broadcast %cst_16 : f32 to vector<32x128xf32>
    %32 = arith.select %30, %11, %31 : vector<32x128xi1>, vector<32x128xf32>
    %c0_17 = arith.constant 0 : index
    %c1 = arith.constant 1 : index
    %33 = vector.load %arg7[%c0_17, %c1] : memref<32x4xf32, #tpu.memory_space<vmem>>, vector<32x1xf32>
    %cst_18 = arith.constant dense<0xFF800000> : vector<32xf32>
    %34 = vector.multi_reduction <maximumf>, %32, %cst_18 [1] : vector<32x128xf32> to vector<32xf32>
    %35 = vector.shape_cast %34 : vector<32xf32> to vector<32x1xf32>
    %36 = arith.maximumf %33, %35 : vector<32x1xf32>
    %37 = arith.subf %33, %36 : vector<32x1xf32>
    %38 = math.exp %37 : vector<32x1xf32>
    %39 = vector.broadcast %36 : vector<32x1xf32> to vector<32x128xf32>
    %40 = arith.subf %32, %39 : vector<32x128xf32>
    %41 = math.exp %40 : vector<32x128xf32>
    %cst_19 = arith.constant dense<0.000000e+00> : vector<32xf32>
    %42 = vector.multi_reduction <add>, %41, %cst_19 [1] : vector<32x128xf32> to vector<32xf32>
    %43 = vector.shape_cast %42 : vector<32xf32> to vector<32x1xf32>
    %c0_20 = arith.constant 0 : index
    %c2 = arith.constant 2 : index
    %44 = vector.load %arg7[%c0_20, %c2] : memref<32x4xf32, #tpu.memory_space<vmem>>, vector<32x1xf32>
    %45 = arith.mulf %38, %44 : vector<32x1xf32>
    %46 = arith.addf %45, %43 : vector<32x1xf32>
    %c0_21 = arith.constant 0 : index
    %c2_22 = arith.constant 2 : index
    %47 = vector.load %arg7[%c0_21, %c2_22] : memref<32x4xf32, #tpu.memory_space<vmem>>, vector<32x1xf32>
    tpu.vector_store %arg7[%c0_21, %c2_22], %46 {strides = array<i32>} : memref<32x4xf32, #tpu.memory_space<vmem>>, vector<32x1xf32>,
    %c0_23 = arith.constant 0 : index
    %c1_24 = arith.constant 1 : index
    %48 = vector.load %arg7[%c0_23, %c1_24] : memref<32x4xf32, #tpu.memory_space<vmem>>, vector<32x1xf32>
    tpu.vector_store %arg7[%c0_23, %c1_24], %36 {strides = array<i32>} : memref<32x4xf32, #tpu.memory_space<vmem>>, vector<32x1xf32>,
    %c2_i32 = arith.constant 2 : i32
    %49 = arith.cmpi eq, %arg1, %c2_i32 : i32
    %50 = arith.extui %49 : i1 to i32
    %c0_i32_25 = arith.constant 0 : i32
    %51 = arith.cmpi ne, %50, %c0_i32_25 : i32
    scf.if %51 {
      %c0_26 = arith.constant 0 : index
      %c1_27 = arith.constant 1 : index
      %52 = vector.load %arg7[%c0_26, %c1_27] : memref<32x4xf32, #tpu.memory_space<vmem>>, vector<32x1xf32>
      %c0_28 = arith.constant 0 : index
      %c2_29 = arith.constant 2 : index
      %53 = vector.load %arg7[%c0_28, %c2_29] : memref<32x4xf32, #tpu.memory_space<vmem>>, vector<32x1xf32>
      %54 = math.log %53 : vector<32x1xf32>
      %55 = arith.addf %52, %54 : vector<32x1xf32>
      %c0_30 = arith.constant 0 : index
      %c3_31 = arith.constant 3 : index
      %56 = vector.load %arg7[%c0_30, %c3_31] : memref<32x4xf32, #tpu.memory_space<vmem>>, vector<32x1xf32>
      %57 = arith.subf %55, %56 : vector<32x1xf32>
      %c0_32 = arith.constant 0 : index
      %c0_33 = arith.constant 0 : index
      %58 = vector.load %arg6[%c0_32, %c0_33] : memref<32x1xf32, #tpu.memory_space<vmem>>, vector<32x1xf32>
      tpu.vector_store %arg6[%c0_32, %c0_33], %57 {strides = array<i32>} : memref<32x1xf32, #tpu.memory_space<vmem>>, vector<32x1xf32>,
    } else {
    }
    return
  }
  func.func @transform_0(%arg0: i32, %arg1: i32) -> (i32, i32) {
    %c0_i32 = arith.constant 0 : i32
    %c0_i32_0 = arith.constant 0 : i32
    return %arg0, %c0_i32 : i32, i32
  }
  func.func @transform_1(%arg0: i32, %arg1: i32) -> (i32, i32) {
    %c0_i32 = arith.constant 0 : i32
    %c0_i32_0 = arith.constant 0 : i32
    return %arg1, %c0_i32 : i32, i32
  }
  func.func @transform_2(%arg0: i32, %arg1: i32) -> (i32, i32) {
    %c0_i32 = arith.constant 0 : i32
    %c0_i32_0 = arith.constant 0 : i32
    return %c0_i32, %arg1 : i32, i32
  }
  func.func @transform_3(%arg0: i32, %arg1: i32) -> (i32, i32) {
    %c0_i32 = arith.constant 0 : i32
    %c0_i32_0 = arith.constant 0 : i32
    return %arg0, %c0_i32 : i32, i32
  }
  func.func @transform_4(%arg0: i32, %arg1: i32) -> (i32, i32) {
    %c0_i32 = arith.constant 0 : i32
    %c0_i32_0 = arith.constant 0 : i32
    return %arg0, %c0_i32 : i32, i32
  }
}

</mosaic_0001>

<bundles_post_ra>
// kernel: tpu_custom_call.1
= control target key start
LH: loop header
LB: loop body
LE: loop exit
PB: predicated region body
PF: predicated region fallthrough
CT: control target
= control target key end

     0   :  { %s1185_s15 = smov 0   ;;  %s1187_s16 = smov 0   ;;  %s1425_s0 = inlined_call_operand.vmem [shape: f32[64,32], index: 0, kind: input, shape index: {}]   ;;  %s1426_s1 = inlined_call_operand.vmem [shape: f32[384,32], index: 1, kind: input, shape index: {}]   ;;  %s1427_s2 = inlined_call_operand.vmem [shape: f32[1,384], index: 2, kind: input, shape index: {}]   ;;  %s1428_s3 = inlined_call_operand.vmem [shape: s32[64,1], index: 3, kind: input, shape index: {}]   ;;  %s1429_s4 = inlined_call_operand.vmem [shape: f32[64,1], index: 4, kind: output, shape index: {}]  }
   0x1   :  { %s1189_s17 = smov 0   ;;  %s1191_s18 = smov 0  }
   0x2   :  { %s1193_s19 = smov 0  }
   0x3 LB: > { %s23_s20 = sadd.s32 1, %s1141_s17  ;;  %s26_s21 = sadd.s32 1, %s1145_s18  ;;  %s1149_s19 = sphi %s1193_s19, %s14_s19   ;;  %s1145_s18 = sphi %s1191_s18, %s1433_s18   ;;  %s1141_s17 = sphi %s1189_s17, %s1432_s17   ;;  %s1137_s16 = sphi %s1187_s16, %s1431_s16   ;;  %s1133_s15 = sphi %s1185_s15, %s1430_s15  }
   0x4   : > { %p24_p0 = scmp.ge.s32.totalorder %s23_s20, 3  ;;  %p897_p1 = scmp.ge.s32.totalorder %s1149_s19, 1 }
   0x5   : > { %p205_p2 = scmp.lt.s32.totalorder %s1149_s19, 7 }
   0x6   : > { %s1435_s20 = smov (%p24_p0, %s23_s20), 0  ;;  %s1437_s21 = smov (!%p24_p0, %s26_s21), %s1145_s18 }
   0x7   : > { %p206_p3 = pnand %p897_p1, %p205_p2  ;;  %p28_p4 = scmp.ge.s32.totalorder %s1437_s21, 2 }
   0x8   : > { %s898_s22 = sshll.u32 (!%p206_p3), %s1137_s16, 2  ;;  %s900_s23 = sshll.u32 (!%p206_p3), %s1133_s15, 4 }
   0x9   : > { %s1439_s21 = smov (%p28_p4, %s1437_s21), 0  ;;  %209 = sbr.rel (%p206_p3) target bundleno = 1295 (0x50f), region = 36 }
   0xa   : > { %p245_p5 = scmp.lt.s32.totalorder (!%p206_p3), %s898_s22, 7  ;;  %p251_p6 = scmp.lt.s32.totalorder (!%p206_p3), %s900_s23, 47 }
   0xb   : > { %p256_p7 = scmp.lt.s32.totalorder (!%p206_p3), %s1133_s15, 2  ;;  %p906_p8 = scmp.ne.s32.totalorder (!%p206_p3), %s1133_s15, 0 }
   0xe   : > { %s1441_s22 = smov (!%p245_p5, %s898_s22), 7  ;;  %s1443_s23 = smov (!%p251_p6, %s900_s23), 47 }
   0xf   : > { %s899_s24 = sshll.u32 %s1441_s22, 3  ;;  %s901_s28 = sshll.u32 %s1443_s23, 3 }
  0x10   : > { %s1222_s27 = scalar_lea.vmem %s1425_s0, %s899_s24  ;;  %s1227_s5 = scalar_lea.vmem %s1426_s1, %s901_s28 }
  0x11   : > { %s1232_s8 = scalar_lea.vmem %s1428_s3, %s899_s24  ;;  %s1240_s12 = scalar_lea.vmem %s1429_s4, %s899_s24 }
  0x12   : > { %s1235_s9 = scalar_select %p256_p7, %s1133_s15, 2 }
  0x13   : > { %274 = sbr.rel (%p906_p8) target bundleno = 196 (0xc4), region = 40 }
  0x14   : > { %s258_s16 = scalar_lea.vmem %s1427_s2, %s1235_s9 }
  0x18   : > { %v277_v0 = vld [vmem:[%s1222_s27 + $0x10] sm:$0xff]  ;;  %vm283_vm0 = vcmask 261120   ;;  %v275_v1 = vld [vmem:[%s1222_s27] sm:$0xff]  ;;  %v278_v2 = vld [vmem:[%s1222_s27 + $0x18] sm:$0xff]  ;;  %vm308_vm1 = vcmask 7168   ;;  %vm313_vm2 = vcmask 15368  }
  0x19   : > { %v281_v3 = vmul.f32 %v277_v0, %v277_v0  ;;  %v279_v4 = vmul.f32 %v275_v1, %v275_v1  ;;  %v282_v5 = vmul.f32 %v278_v2, %v278_v2  ;;  %v276_v6 = vld [vmem:[%s1222_s27 + $0x8] sm:$0xff]  ;;  %vm318_vm3 = vcmask 23568  }
  0x1a   : > { %v280_v7 = vmul.f32 %v276_v6, %v276_v6  ;;  %vm323_vm4 = vcmask 31768   ;;  %v1151_v25 = vmov -inf   ;;  %v1152_v27 = vmov 0.0  }
  0x1b   : > { %v290_v8 = vsel %vm283_vm0, %v281_v3, 0.0  ;;  %v284_v9 = vsel %vm283_vm0, %v279_v4, 0.0  ;;  %v293_v10 = vsel %vm283_vm0, %v282_v5, 0.0 }
  0x1c   : > { %291 = vadd.xlane.f32.xlu1 %v290_v8  ;;  %285 = vadd.xlane.f32.xlu0 %v284_v9  ;;  %v287_v11 = vsel %vm283_vm0, %v280_v7, 0.0 }
  0x20   : > { %294 = vadd.xlane.f32.xlu1 %v293_v10  ;;  %288 = vadd.xlane.f32.xlu0 %v287_v11 }
  0xa5   : > { %v292_v12 = vpop.xlane.xlu1 %291  ;;  %v286_v13 = vpop.xlane.xlu0 %285 }
  0xa6   : > { %v298_v14 = vmax.f32 %v292_v12, 1e-24  ;;  %v296_v15 = vmax.f32 %v286_v13, 1e-24 }
  0xa8   : > { %1075 = vrsqrt.f32 %v298_v14 }
  0xa9   : > { %1077 = vrsqrt.f32 %v296_v15  ;;  %v295_v16 = vpop.xlane.xlu1 %294  ;;  %v289_v17 = vpop.xlane.xlu0 %288 }
  0xaa   : > { %v299_v18 = vmax.f32 %v295_v16, 1e-24  ;;  %v297_v19 = vmax.f32 %v289_v17, 1e-24 }
  0xac   : > { %1079 = vrsqrt.f32 %v299_v18 }
  0xad   : > { %1081 = vrsqrt.f32 %v297_v19 }
  0xb5   : > { %v1076_v20 = vpop.eup %1075 }
  0xb6   : > { %v1078_v21 = vpop.eup %1077  ;;  %v306_v22 = vmul.f32 20.0, %v1076_v20 }
  0xb7   : > { %v304_v23 = vmul.f32 20.0, %v1078_v21 }
  0xb8   : > { %311 = vst.msk [vmem:[#allocation2 + $0x10] sm:$0xff] %vm308_vm1, %v306_v22 }
  0xb9   : > { %v1080_v24 = vpop.eup %1079  ;;  %316 = vst.msk [vmem:[#allocation2 + $0x10] sm:$0xff] %vm313_vm2, %v1151_v25 }
  0xba   : > { %309 = vst.msk [vmem:[#allocation2] sm:$0xff] %vm308_vm1, %v304_v23  ;;  %v1082_v26 = vpop.eup %1081  ;;  %v307_v28 = vmul.f32 20.0, %v1080_v24 }
  0xbb   : > { %321 = vst.msk [vmem:[#allocation2 + $0x10] sm:$0xff] %vm318_vm3, %v1152_v27  ;;  %v305_v29 = vmul.f32 20.0, %v1082_v26 }
  0xbc   : > { %314 = vst.msk [vmem:[#allocation2] sm:$0xff] %vm313_vm2, %v1151_v25 }
  0xbd   : > { %326 = vst.msk [vmem:[#allocation2 + $0x10] sm:$0xff] %vm323_vm4, %v1152_v27 }
  0xbe   : > { %319 = vst.msk [vmem:[#allocation2] sm:$0xff] %vm318_vm3, %v1152_v27 }
  0xbf   : > { %324 = vst.msk [vmem:[#allocation2] sm:$0xff] %vm323_vm4, %v1152_v27 }
  0xc0   : > { %312 = vst.msk [vmem:[#allocation2 + $0x18] sm:$0xff] %vm308_vm1, %v307_v28  ;;  %310 = vst.msk [vmem:[#allocation2 + $0x8] sm:$0xff] %vm308_vm1, %v305_v29 }
  0xc1   : > { %317 = vst.msk [vmem:[#allocation2 + $0x18] sm:$0xff] %vm313_vm2, %v1151_v25  ;;  %315 = vst.msk [vmem:[#allocation2 + $0x8] sm:$0xff] %vm313_vm2, %v1151_v25 }
  0xc2   : > { %322 = vst.msk [vmem:[#allocation2 + $0x18] sm:$0xff] %vm318_vm3, %v1152_v27  ;;  %320 = vst.msk [vmem:[#allocation2 + $0x8] sm:$0xff] %vm318_vm3, %v1152_v27 }
  0xc3   : > { %327 = vst.msk [vmem:[#allocation2 + $0x18] sm:$0xff] %vm323_vm4, %v1152_v27  ;;  %325 = vst.msk [vmem:[#allocation2 + $0x8] sm:$0xff] %vm323_vm4, %v1152_v27 }
  0xc4 PF: > { %v347_v30 = vld [vmem:[%s1227_s5 + $0x78] sm:$0xff]  ;;  %vm348_vm5 = vcmask 261120   ;;  %v346_v31 = vld [vmem:[%s1227_s5 + $0x70] sm:$0xff]  ;;  %v345_v32 = vld [vmem:[%s1227_s5 + $0x68] sm:$0xff]  ;;  %v1153_v33 = vmov 0   ;;  %s928_s22 = sshll.u32 %s1133_s15, 7  ;;  %v533_v4 = vlaneseq }
  0xc5   : > { %956 = vmatprep.subr.msk.mxu0 %vm348_vm5, %v347_v30  ;;  %994 = vmatprep.subr.msk.mxu1 %vm348_vm5, %v347_v30  ;;  %v328_v34 = vld [vmem:[%s1222_s27] sm:$0xff]  ;;  %v330_v35 = vld [vmem:[%s1222_s27 + $0x10] sm:$0xff]  ;;  %v540_v42 = vstv %s928_s22  ;;  %v536_v43 = vld [vmem:[%s1232_s8 + $0x8] sm:$0xff]  ;;  %s590_s25 = ssub.s32 300, %s928_s22  ;;  %v1154_v17 = vmov 0.0   ;;  %vm585_vm11 = vcmask 31768  }
  0xc6   : > { %957 = vmatpush3.xpose.msk.msra.mxu0 %vm348_vm5, %v347_v30  ;;  %1010 = vmatpush3.xpose.msk.msra.mxu1 %vm348_vm5, %v347_v30  ;;  %v1280_v36 = vld [vmem:[#allocation2] sm:$0xff]  ;;  %v1284_v37 = vld [vmem:[#allocation2 + $0x10] sm:$0xff]  ;;  %v343_v44 = vld [vmem:[%s1227_s5 + $0x58] sm:$0xff]  ;;  %v542_v46 = vsub.s32 %v536_v43, %v540_v42  ;;  %v534_v6 = vand.u32 127, %v533_v4  ;;  %v591_v23 = vstv %s590_s25  ;;  %s1156_s26 = smov 127   ;;  %vm705_vm12 = vcmask 23568  }
  0xc7   : > { %958 = vmatprep.subr.msk.mxu0 %vm348_vm5, %v346_v31  ;;  %995 = vmatprep.subr.msk.mxu1 %vm348_vm5, %v346_v31  ;;  %v344_v38 = vld [vmem:[%s1227_s5 + $0x60] sm:$0xff]  ;;  %v537_v47 = vld [vmem:[%s1232_s8 + $0x10] sm:$0xff]  ;;  %v538_v48 = vld [vmem:[%s1232_s8 + $0x18] sm:$0xff]  ;;  %vm710_vm13 = vcmask 15368   ;;  %p933_p9 = scmp.ne.s32.totalorder %s1133_s15, 2 }
  0xc8   : > { %1083 = vset.pattern.permute.xlu0 %v1153_v33  ;;  %1084 = vset.pattern.permute.xlu1 %v1153_v33  ;;  %v535_v41 = vld [vmem:[%s1232_s8] sm:$0xff]  ;;  %v342_v49 = vld [vmem:[%s1227_s5 + $0x50] sm:$0xff]  ;;  %v543_v50 = vsub.s32 %v537_v47, %v540_v42  ;;  %v544_v51 = vsub.s32 %v538_v48, %v540_v42  ;;  %v341_v52 = vld [vmem:[%s1227_s5 + $0x48] sm:$0xff]  ;;  %vm592_vm9 = vcmp.lt.s32.totalorder %v534_v6, %v591_v23  ;;  %s1158_s28 = smov (!%p933_p9), 126   ;;  %s1159_s29 = smov (!%p933_p9), 127  }
  0xc9   : > { %988 = vmatprep.mubr.msk.f32.mxu0 %vm348_vm5, %v328_v34  ;;  %991 = vmatprep.mubr.msk.f32.mxu1 %vm348_vm5, %v330_v35  ;;  %v541_v45 = vsub.s32 %v535_v41, %v540_v42  ;;  %v340_v53 = vld [vmem:[%s1227_s5 + $0x40] sm:$0xff]  ;;  %v339_v54 = vld [vmem:[%s1227_s5 + $0x38] sm:$0xff]  ;;  %v338_v55 = vld [vmem:[%s1227_s5 + $0x30] sm:$0xff]  ;;  %v1155_v41 = vmov 1  }
  0xca   : > { %959 = vmatpush3.xpose.msk.msra.mxu0 %vm348_vm5, %v346_v31  ;;  %1011 = vmatpush3.xpose.msk.msra.mxu1 %vm348_vm5, %v346_v31  ;;  %v1292_v39 = vld [vmem:[#allocation2 + $0x8] sm:$0xff]  ;;  %v1296_v40 = vld [vmem:[#allocation2 + $0x18] sm:$0xff]  ;;  %v336_v57 = vld [vmem:[%s1227_s5 + $0x20] sm:$0xff] }
  0xcb   : > { %960 = vmatprep.subr.msk.mxu0 %vm348_vm5, %v345_v32  ;;  %996 = vmatprep.subr.msk.mxu1 %vm348_vm5, %v345_v32  ;;  %v337_v56 = vld [vmem:[%s1227_s5 + $0x28] sm:$0xff]  ;;  %v335_v58 = vld [vmem:[%s1227_s5 + $0x18] sm:$0xff]  ;;  %v334_v59 = vld [vmem:[%s1227_s5 + $0x10] sm:$0xff] }
  0xcc   : > { %500 = vperm.xlu0 %1083, %v1280_v36   ;;  %510 = vperm.xlu1 %1084, %v1284_v37   ;;  %v333_v60 = vld [vmem:[%s1227_s5 + $0x8] sm:$0xff]  ;;  %v332_v61 = vld [vmem:[%s1227_s5] sm:$0xff]  ;;  %v331_v63 = vld [vmem:[%s1222_s27 + $0x18] sm:$0xff] }
  0xcd   : > { %v329_v62 = vld [vmem:[%s1222_s27 + $0x8] sm:$0xff]  ;;  %v927_v9 = vld [vmem:[%s258_s16] ss:$0 sm:$0xff]  ;;  %s1157_s27 = smov 1  }
  0xce   : > { %961 = vmatpush3.xpose.msk.msra.mxu0 %vm348_vm5, %v345_v32  ;;  %1012 = vmatpush3.xpose.msk.msra.mxu1 %vm348_vm5, %v345_v32 }
  0xcf   : > { %962 = vmatprep.subr.msk.mxu0 %vm348_vm5, %v344_v38  ;;  %997 = vmatprep.subr.msk.mxu1 %vm348_vm5, %v344_v38 }
  0xd0   : > { %505 = vperm.xlu0 %1083, %v1292_v39   ;;  %515 = vperm.xlu1 %1084, %v1296_v40  }
  0xd2   : > { %963 = vmatpush3.xpose.msk.msra.mxu0 %vm348_vm5, %v344_v38  ;;  %1013 = vmatpush3.xpose.msk.msra.mxu1 %vm348_vm5, %v344_v38 }
  0xd3   : > { %964 = vmatprep.subr.msk.mxu0 %vm348_vm5, %v343_v44  ;;  %998 = vmatprep.subr.msk.mxu1 %vm348_vm5, %v343_v44 }
  0xd4   : > { %546 = vperm.xlu0 %1083, %v541_v45   ;;  %549 = vperm.xlu1 %1084, %v542_v46  }
  0xd6   : > { %965 = vmatpush3.xpose.msk.msra.mxu0 %vm348_vm5, %v343_v44  ;;  %1014 = vmatpush3.xpose.msk.msra.mxu1 %vm348_vm5, %v343_v44 }
  0xd7   : > { %966 = vmatprep.subr.msk.mxu0 %vm348_vm5, %v342_v49  ;;  %999 = vmatprep.subr.msk.mxu1 %vm348_vm5, %v342_v49 }
  0xd8   : > { %552 = vperm.xlu0 %1083, %v543_v50   ;;  %555 = vperm.xlu1 %1084, %v544_v51  }
  0xda   : > { %967 = vmatpush3.xpose.msk.msra.mxu0 %vm348_vm5, %v342_v49  ;;  %1015 = vmatpush3.xpose.msk.msra.mxu1 %vm348_vm5, %v342_v49 }
  0xdb   : > { %968 = vmatprep.subr.msk.mxu0 %vm348_vm5, %v341_v52  ;;  %1000 = vmatprep.subr.msk.mxu1 %vm348_vm5, %v341_v52 }
  0xdc   : > { %1086 = vset.pattern.permute.xlu1 %v1155_v41  ;;  %1085 = vset.pattern.permute.xlu0 %v1155_v41 }
  0xde   : > { %969 = vmatpush3.xpose.msk.msra.mxu0 %vm348_vm5, %v341_v52  ;;  %1016 = vmatpush3.xpose.msk.msra.mxu1 %vm348_vm5, %v341_v52 }
  0xdf   : > { %970 = vmatprep.subr.msk.mxu0 %vm348_vm5, %v340_v53  ;;  %1001 = vmatprep.subr.msk.mxu1 %vm348_vm5, %v340_v53 }
  0xe2   : > { %971 = vmatpush3.xpose.msk.msra.mxu0 %vm348_vm5, %v340_v53  ;;  %1017 = vmatpush3.xpose.msk.msra.mxu1 %vm348_vm5, %v340_v53 }
  0xe3   : > { %972 = vmatprep.subr.msk.mxu0 %vm348_vm5, %v339_v54  ;;  %1002 = vmatprep.subr.msk.mxu1 %vm348_vm5, %v339_v54 }
  0xe6   : > { %973 = vmatpush3.xpose.msk.msra.mxu0 %vm348_vm5, %v339_v54  ;;  %1018 = vmatpush3.xpose.msk.msra.mxu1 %vm348_vm5, %v339_v54 }
  0xe7   : > { %974 = vmatprep.subr.msk.mxu0 %vm348_vm5, %v338_v55  ;;  %1003 = vmatprep.subr.msk.mxu1 %vm348_vm5, %v338_v55 }
  0xea   : > { %975 = vmatpush3.xpose.msk.msra.mxu0 %vm348_vm5, %v338_v55  ;;  %1019 = vmatpush3.xpose.msk.msra.mxu1 %vm348_vm5, %v338_v55 }
  0xeb   : > { %976 = vmatprep.subr.msk.mxu0 %vm348_vm5, %v337_v56  ;;  %1004 = vmatprep.subr.msk.mxu1 %vm348_vm5, %v337_v56 }
  0xee   : > { %977 = vmatpush3.xpose.msk.msra.mxu0 %vm348_vm5, %v337_v56  ;;  %1020 = vmatpush3.xpose.msk.msra.mxu1 %vm348_vm5, %v337_v56 }
  0xef   : > { %978 = vmatprep.subr.msk.mxu0 %vm348_vm5, %v336_v57  ;;  %1005 = vmatprep.subr.msk.mxu1 %vm348_vm5, %v336_v57 }
  0xf2   : > { %979 = vmatpush3.xpose.msk.msra.mxu0 %vm348_vm5, %v336_v57  ;;  %1021 = vmatpush3.xpose.msk.msra.mxu1 %vm348_vm5, %v336_v57 }
  0xf3   : > { %980 = vmatprep.subr.msk.mxu0 %vm348_vm5, %v335_v58  ;;  %1006 = vmatprep.subr.msk.mxu1 %vm348_vm5, %v335_v58 }
  0xf6   : > { %981 = vmatpush3.xpose.msk.msra.mxu0 %vm348_vm5, %v335_v58  ;;  %1022 = vmatpush3.xpose.msk.msra.mxu1 %vm348_vm5, %v335_v58 }
  0xf7   : > { %982 = vmatprep.subr.msk.mxu0 %vm348_vm5, %v334_v59  ;;  %1007 = vmatprep.subr.msk.mxu1 %vm348_vm5, %v334_v59 }
  0xfa   : > { %983 = vmatpush3.xpose.msk.msra.mxu0 %vm348_vm5, %v334_v59  ;;  %1023 = vmatpush3.xpose.msk.msra.mxu1 %vm348_vm5, %v334_v59 }
  0xfb   : > { %984 = vmatprep.subr.msk.mxu0 %vm348_vm5, %v333_v60  ;;  %1008 = vmatprep.subr.msk.mxu1 %vm348_vm5, %v333_v60 }
  0xfe   : > { %985 = vmatpush3.xpose.msk.msra.mxu0 %vm348_vm5, %v333_v60  ;;  %1024 = vmatpush3.xpose.msk.msra.mxu1 %vm348_vm5, %v333_v60 }
  0xff   : > { %986 = vmatprep.subr.msk.mxu0 %vm348_vm5, %v332_v61  ;;  %1009 = vmatprep.subr.msk.mxu1 %vm348_vm5, %v332_v61 }
 0x102   : > { %987 = vmatpush3.xpose.msk.msra.mxu0 %vm348_vm5, %v332_v61  ;;  %1025 = vmatpush3.xpose.msk.msra.mxu1 %vm348_vm5, %v332_v61 }
 0x105   : > { %989 = vmatmul.mubr.msk.f32.vlgmr.msra.gmra.mxu0 %vm348_vm5, %v329_v62  ;;  %992 = vmatmul.mubr.msk.f32.vlgmr.msra.gmra.mxu1 %vm348_vm5, %v331_v63 }
 0x147   : > { %v501_v0 = vpop.permute.xlu0 %500  ;;  %v511_v1 = vpop.permute.xlu1 %510 }
 0x14b   : > { %v506_v2 = vpop.permute.xlu0 %505  ;;  %v516_v3 = vpop.permute.xlu1 %515 }
 0x14f   : > { %v547_v5 = vpop.permute.xlu0 %546  ;;  %v550_v7 = vpop.permute.xlu1 %549 }
 0x150   : > { %vm558_vm6 = vcmp.eq.s32.totalorder %v534_v6, %v550_v7  ;;  %vm557_vm7 = vcmp.eq.s32.totalorder %v534_v6, %v547_v5 }
 0x151   : > { %v930_v18 = vsel %vm558_vm6, 1.0, %v1154_v17  ;;  %v929_v22 = vsel %vm557_vm7, 1.0, %v1154_v17 }
 0x153   : > { %v553_v19 = vpop.permute.xlu0 %552  ;;  %v556_v27 = vpop.permute.xlu1 %555 }
 0x154   : > { %vm559_vm8 = vcmp.eq.s32.totalorder %v534_v6, %v553_v19  ;;  %vm560_vm10 = vcmp.eq.s32.totalorder %v534_v6, %v556_v27 }
 0x155   : > { %v931_v28 = vsel %vm559_vm8, 1.0, %v1154_v17  ;;  %v932_v32 = vsel %vm560_vm10, 1.0, %v1154_v17 }
 0x1c5   : > { %v990_v8 = vpop.f32.mrf.mxu0  ;;  %v993_v10 = vpop.f32.mrf.mxu1 }
 0x1c6   : > { %v519_v11 = vmul.f32 %v990_v8, %v506_v2  ;;  %v521_v24 = vmul.f32 %v993_v10, %v516_v3 }
 0x1c7   : > { %v475_v12 = vpop.f32.mrf.mxu0  ;;  %v485_v13 = vpop.f32.mrf.mxu1 }
 0x1c8   : > { %v530_v14 = vmul.f32 %v927_v9, %v519_v11  ;;  %v518_v15 = vmul.f32 %v501_v0, %v475_v12  ;;  %v520_v16 = vmul.f32 %v511_v1, %v485_v13  ;;  %v532_v30 = vmul.f32 %v927_v9, %v521_v24 }
 0x1ca   : > { %v529_v20 = vmul.f32 %v927_v9, %v518_v15  ;;  %v570_v21 = vmul.f32 %v930_v18, %v530_v14  ;;  %v531_v25 = vmul.f32 %v927_v9, %v520_v16  ;;  %v572_v34 = vmul.f32 %v932_v32, %v532_v30 }
 0x1cb   : > { %v594_v35 = vsel %vm592_vm9, %v530_v14, -inf  ;;  %v596_v38 = vsel %vm592_vm9, %v532_v30, -inf }
 0x1cc   : > { %575 = vadd.xlane.f32.xlu1 %v570_v21  ;;  %v569_v26 = vmul.f32 %v929_v22, %v529_v20  ;;  %v593_v29 = vsel %vm592_vm9, %v529_v20, -inf  ;;  %v571_v31 = vmul.f32 %v931_v28, %v531_v25  ;;  %v595_v33 = vsel %vm592_vm9, %v531_v25, -inf }
 0x1ce   : > { %573 = vadd.xlane.f32.xlu0 %v569_v26 }
 0x1d0   : > { %601 = vmax.xlane.f32.xlu1 %v593_v29 }
 0x1d2   : > { %577 = vadd.xlane.f32.xlu0 %v571_v31 }
 0x1d4   : > { %605 = vmax.xlane.f32.xlu1 %v595_v33 }
 0x1d6   : > { %579 = vadd.xlane.f32.xlu0 %v572_v34 }
 0x1da   : > { %603 = vmax.xlane.f32.xlu0 %v594_v35 }
 0x1de   : > { %607 = vmax.xlane.f32.xlu0 %v596_v38 }
 0x255   : > { %v576_v42 = vpop.xlane.xlu1 %575 }
 0x256   : > { %v582_v43 = vadd.f32 %v576_v42, %v1292_v39 }
 0x257   : > { %v574_v44 = vpop.xlane.xlu0 %573 }
 0x258   : > { %587 = vst.msk [vmem:[#allocation2 + $0x8] sm:$0xff] %vm585_vm11, %v582_v43  ;;  %v581_v45 = vadd.f32 %v574_v44, %v1280_v36 }
 0x259   : > { %v602_v48 = vpop.xlane.xlu1 %601 }
 0x25a   : > { %586 = vst.msk [vmem:[#allocation2] sm:$0xff] %vm585_vm11, %v581_v45 }
 0x25b   : > { %v578_v46 = vpop.xlane.xlu0 %577 }
 0x25c   : > { %v583_v47 = vadd.f32 %v578_v46, %v1284_v37 }
 0x25d   : > { %v606_v36 = vpop.xlane.xlu1 %605 }
 0x25e   : > { %588 = vst.msk [vmem:[#allocation2 + $0x10] sm:$0xff] %vm585_vm11, %v583_v47 }
 0x25f   : > { %v580_v49 = vpop.xlane.xlu0 %579  ;;  %v598_v53 = vld [vmem:[#allocation2 + $0x8] sm:$0xff] }
 0x260   : > { %v584_v50 = vadd.f32 %v580_v49, %v1296_v40 }
 0x261   : > { %v597_v51 = vld [vmem:[#allocation2] sm:$0xff] }
 0x262   : > { %v1385_v52 = vmax.f32 %v597_v51, %v602_v48  ;;  %589 = vst.msk [vmem:[#allocation2 + $0x18] sm:$0xff] %vm585_vm11, %v584_v50 }
 0x263   : > { %v604_v54 = vpop.xlane.xlu0 %603 }
 0x264   : > { %v1387_v39 = vmax.f32 %v598_v53, %v604_v54  ;;  %627 = vperm.xlu1 %1086, %v1385_v52   ;;  %v613_v11 = vsub.f32 %v597_v51, %v1385_v52 }
 0x265   : > { %v599_v55 = vld [vmem:[#allocation2 + $0x10] sm:$0xff] }
 0x266   : > { %v1390_v56 = vmax.f32 %v599_v55, %v606_v36  ;;  %632 = vperm.xlu0 %1085, %v1387_v39   ;;  %v614_v10 = vsub.f32 %v598_v53, %v1387_v39  ;;  %v617_v13 = vmul.f32 1.442695, %v613_v11 }
 0x267   : > { %v608_v40 = vpop.xlane.xlu0 %607 }
 0x268   : > { %637 = vperm.xlu1 %1086, %v1390_v56   ;;  %v619_v12 = vmul.f32 1.442695, %v614_v10  ;;  %v615_v14 = vsub.f32 %v599_v55, %v1390_v56 }
 0x269   : > { %v600_v37 = vld [vmem:[#allocation2 + $0x18] sm:$0xff] }
 0x26a   : > { %v1394_v57 = vmax.f32 %v600_v37, %v608_v40  ;;  %v621_v15 = vmul.f32 1.442695, %v615_v14 }
 0x26c   : > { %642 = vperm.xlu1 %1086, %v1394_v57   ;;  %v616_v17 = vsub.f32 %v600_v37, %v1394_v57 }
 0x26e   : > { %v623_v19 = vmul.f32 1.442695, %v616_v17 }
 0x270   : > { %669 = vrot.lane.b32.xlu1 %v597_v51, %s1156_s26 }
 0x274   : > { %673 = vrot.lane.b32.xlu1 %v599_v55, %s1156_s26 }
 0x2df   : > { %v628_v58 = vpop.permute.xlu1 %627 }
 0x2e0   : > { %v645_v0 = vsub.f32 %v593_v29, %v628_v58 }
 0x2e1   : > { %v633_v59 = vpop.permute.xlu0 %632 }
 0x2e2   : > { %v646_v60 = vsub.f32 %v594_v35, %v633_v59  ;;  %v649_v3 = vmul.f32 1.442695, %v645_v0 }
 0x2e3   : > { %v638_v61 = vpop.permute.xlu1 %637 }
 0x2e4   : > { %v651_v62 = vmul.f32 1.442695, %v646_v60  ;;  %v647_v4 = vsub.f32 %v595_v33, %v638_v61 }
 0x2e6   : > { %1087 = vpow2.f32 %v651_v62  ;;  %v653_v5 = vmul.f32 1.442695, %v647_v4 }
 0x2e7   : > { %v643_v63 = vpop.permute.xlu1 %642 }
 0x2e8   : > { %v648_v1 = vsub.f32 %v596_v38, %v643_v63 }
 0x2ea   : > { %v655_v2 = vmul.f32 1.442695, %v648_v1 }
 0x2eb   : > { %v670_v16 = vpop.permute.xlu1 %669 }
 0x2ec   : > { %1089 = vpow2.f32 %v655_v2 }
 0x2ed   : > { %1091 = vpow2.f32 %v649_v3 }
 0x2ee   : > { %1093 = vpow2.f32 %v653_v5 }
 0x2ef   : > { %1095 = vpow2.f32 %v619_v12  ;;  %v674_v20 = vpop.permute.xlu1 %673 }
 0x2f0   : > { %1097 = vpow2.f32 %v617_v13 }
 0x2f1   : > { %1099 = vpow2.f32 %v621_v15 }
 0x2f2   : > { %1101 = vpow2.f32 %v623_v19 }
 0x2f3   : > { %v1088_v6 = vpop.eup %1087 }
 0x2f4   : > { %659 = vadd.xlane.f32.xlu0 %v1088_v6 }
 0x2f9   : > { %v1090_v7 = vpop.eup %1089 }
 0x2fa   : > { %663 = vadd.xlane.f32.xlu1 %v1090_v7  ;;  %v1092_v8 = vpop.eup %1091 }
 0x2fb   : > { %v1094_v9 = vpop.eup %1093 }
 0x2fc   : > { %v1096_v21 = vpop.eup %1095 }
 0x2fd   : > { %v1098_v26 = vpop.eup %1097 }
 0x2fe   : > { %657 = vadd.xlane.f32.xlu1 %v1092_v8  ;;  %v681_v27 = vmul.f32 %v1098_v26, %v670_v16  ;;  %v1100_v30 = vpop.eup %1099 }
 0x2ff   : > { %v683_v31 = vmul.f32 %v1100_v30, %v674_v20  ;;  %v1102_v34 = vpop.eup %1101 }
 0x302   : > { %661 = vadd.xlane.f32.xlu1 %v1094_v9 }
 0x30a   : > { %671 = vrot.lane.b32.xlu0 %v598_v53, %s1156_s26 }
 0x313   : > { %675 = vrot.lane.b32.xlu1 %v600_v37, %s1156_s26 }
 0x37d   : > { %v660_v18 = vpop.xlane.xlu0 %659 }
 0x381   : > { %v672_v22 = vpop.permute.xlu0 %671 }
 0x382   : > { %v682_v23 = vmul.f32 %v1096_v21, %v672_v22 }
 0x383   : > { %v664_v24 = vpop.xlane.xlu1 %663 }
 0x384   : > { %v686_v25 = vadd.f32 %v682_v23, %v660_v18 }
 0x386   : > { %695 = vrot.lane.b32.xlu1 %v686_v25, %s1157_s27 }
 0x387   : > { %v658_v28 = vpop.xlane.xlu1 %657 }
 0x388   : > { %v685_v29 = vadd.f32 %v681_v27, %v658_v28 }
 0x38a   : > { %693 = vrot.lane.b32.xlu1 %v685_v29, %s1157_s27 }
 0x38b   : > { %v662_v32 = vpop.xlane.xlu1 %661 }
 0x38c   : > { %v687_v33 = vadd.f32 %v683_v31, %v662_v32 }
 0x38e   : > { %697 = vrot.lane.b32.xlu0 %v687_v33, %s1157_s27 }
 0x38f   : > { %v676_v35 = vpop.permute.xlu1 %675 }
 0x390   : > { %v684_v38 = vmul.f32 %v1102_v34, %v676_v35 }
 0x392   : > { %v688_v41 = vadd.f32 %v684_v38, %v664_v24 }
 0x394   : > { %699 = vrot.lane.b32.xlu1 %v688_v41, %s1157_s27 }
 0x3f8   : > { %v696_v42 = vpop.permute.xlu1 %695 }
 0x3f9   : > { %707 = vst.msk [vmem:[#allocation2 + $0x8] sm:$0xff] %vm705_vm12, %v696_v42 }
 0x3fa   : > { %712 = vst.msk [vmem:[#allocation2 + $0x8] sm:$0xff] %vm710_vm13, %v1387_v39 }
 0x3fc   : > { %v694_v43 = vpop.permute.xlu1 %693 }
 0x3fd   : > { %706 = vst.msk [vmem:[#allocation2] sm:$0xff] %vm705_vm12, %v694_v43 }
 0x3fe   : > { %711 = vst.msk [vmem:[#allocation2] sm:$0xff] %vm710_vm13, %v1385_v52 }
 0x400   : > { %v698_v44 = vpop.permute.xlu0 %697 }
 0x401   : > { %708 = vst.msk [vmem:[#allocation2 + $0x10] sm:$0xff] %vm705_vm12, %v698_v44 }
 0x402   : > { %713 = vst.msk [vmem:[#allocation2 + $0x10] sm:$0xff] %vm710_vm13, %v1390_v56 }
 0x404   : > { %718 = sbr.rel (%p933_p9) target bundleno = 1295 (0x50f), region = 44 }
 0x406   : > { %v700_v45 = vpop.permute.xlu1 %699 }
 0x407   : > { %709 = vst.msk [vmem:[#allocation2 + $0x18] sm:$0xff] %vm705_vm12, %v700_v45 }
 0x408   : > { %714 = vst.msk [vmem:[#allocation2 + $0x18] sm:$0xff] %vm710_vm13, %v1394_v57 }
 0x409   : > { %v719_v46 = vld [vmem:[#allocation2] sm:$0xff]  ;;  %v720_v47 = vld [vmem:[#allocation2 + $0x8] sm:$0xff]  ;;  %v721_v48 = vld [vmem:[#allocation2 + $0x10] sm:$0xff]  ;;  %vm787_vm14 = vcmask 7168  }
 0x40a   : > { %755 = vrot.lane.b32.xlu1 %v719_v46, %s1158_s28  ;;  %1103 = vlog2.f32 %v719_v46 }
 0x40b   : > { %1105 = vlog2.f32 %v720_v47 }
 0x40c   : > { %1107 = vlog2.f32 %v721_v48 }
 0x40e   : > { %757 = vrot.lane.b32.xlu1 %v720_v47, %s1158_s28 }
 0x40f   : > { %v722_v49 = vld [vmem:[#allocation2 + $0x18] sm:$0xff] }
 0x410   : > { %1109 = vlog2.f32 %v722_v49 }
 0x417   : > { %v1104_v50 = vpop.eup %1103 }
 0x418   : > { %v1106_v51 = vpop.eup %1105  ;;  %v724_v52 = vmul.f32 0.6931472, %v1104_v50 }
 0x419   : > { %v1108_v53 = vpop.eup %1107  ;;  %v726_v54 = vmul.f32 0.6931472, %v1106_v51 }
 0x41a   : > { %735 = vrot.lane.b32.xlu0 %v724_v52, %s1159_s29  ;;  %v728_v39 = vmul.f32 0.6931472, %v1108_v53 }
 0x41c   : > { %739 = vrot.lane.b32.xlu1 %v728_v39, %s1159_s29 }
 0x41d   : > { %v1110_v36 = vpop.eup %1109 }
 0x41e   : > { %737 = vrot.lane.b32.xlu0 %v726_v54, %s1159_s29  ;;  %v730_v55 = vmul.f32 0.6931472, %v1110_v36 }
 0x420   : > { %761 = vrot.lane.b32.xlu1 %v722_v49, %s1158_s28 }
 0x422   : > { %741 = vrot.lane.b32.xlu0 %v730_v55, %s1159_s29 }
 0x426   : > { %759 = vrot.lane.b32.xlu0 %v721_v48, %s1158_s28 }
 0x47c   : > { %v756_v56 = vpop.permute.xlu1 %755 }
 0x480   : > { %v758_v37 = vpop.permute.xlu1 %757 }
 0x48c   : > { %v736_v40 = vpop.permute.xlu0 %735 }
 0x48d   : > { %v747_v57 = vadd.f32 %v736_v40, %v719_v46 }
 0x48e   : > { %v740_v58 = vpop.permute.xlu1 %739 }
 0x48f   : > { %v767_v59 = vsub.f32 %v747_v57, %v756_v56  ;;  %v749_v1 = vadd.f32 %v740_v58, %v721_v48 }
 0x490   : > { %v738_v60 = vpop.permute.xlu0 %737 }
 0x491   : > { %v748_v61 = vadd.f32 %v738_v60, %v720_v47  ;;  %775 = vrot.lane.b32.xlu0 %v767_v59, %s1159_s29 }
 0x492   : > { %v762_v0 = vpop.permute.xlu1 %761 }
 0x493   : > { %v768_v62 = vsub.f32 %v748_v61, %v758_v37 }
 0x494   : > { %v742_v63 = vpop.permute.xlu0 %741 }
 0x495   : > { %v750_v2 = vadd.f32 %v742_v63, %v722_v49  ;;  %777 = vrot.lane.b32.xlu1 %v768_v62, %s1159_s29 }
 0x497   : > { %v770_v3 = vsub.f32 %v750_v2, %v762_v0 }
 0x498   : > { %v760_v4 = vpop.permute.xlu0 %759 }
 0x499   : > { %v769_v5 = vsub.f32 %v749_v1, %v760_v4  ;;  %781 = vrot.lane.b32.xlu1 %v770_v3, %s1159_s29 }
 0x49b   : > { %779 = vrot.lane.b32.xlu0 %v769_v5, %s1159_s29 }
 0x503   : > { %v776_v6 = vpop.permute.xlu0 %775 }
 0x504   : > { %788 = vst.msk [vmem:[%s1240_s12] sm:$0xff] %vm787_vm14, %v776_v6 }
 0x507   : > { %v778_v7 = vpop.permute.xlu1 %777 }
 0x508   : > { %789 = vst.msk [vmem:[%s1240_s12 + $0x8] sm:$0xff] %vm787_vm14, %v778_v7 }
 0x50b   : > { %v782_v9 = vpop.permute.xlu1 %781 }
 0x50c   : > { %791 = vst.msk [vmem:[%s1240_s12 + $0x18] sm:$0xff] %vm787_vm14, %v782_v9 }
 0x50d   : > { %v780_v8 = vpop.permute.xlu0 %779 }
 0x50e   : > { %790 = vst.msk [vmem:[%s1240_s12 + $0x10] sm:$0xff] %vm787_vm14, %v780_v8 }
 0x50f PF: > { %s14_s19 = sadd.s32 1, %s1149_s19   ;;  %s1430_s15 = smov %s1141_s17 }
 0x510   : > { %p11_p10 = scmp.ge.s32.totalorder %s14_s19, 8   ;;  %s1431_s16 = smov %s1145_s18 }
 0x511   : > { %s1432_s17 = smov %s1435_s20  ;;  %s1433_s18 = smov %s1439_s21 }
 0x512   :  { %13 = sbr.rel (!%p11_p10) target bundleno = 3 (0x3), region = 83 }

</bundles_post_ra>
